<compile_context>
chip_gen: v5e
topology: v5e:2x2
jax: 0.10.0
libtpu: 0.0.40
codegen_flags: <defaults>
</compile_context>

<pallas_src>
import jax
import jax.numpy as jnp
from jax.experimental import pallas as pl
from jax.experimental.pallas import tpu as pltpu


def _round_up(n, m):
    return ((n + m - 1) // m) * m


def _cdiv(a, b):
    return -(-a // b)


def _pad_dim(n):
    # 256-align large dims (v6e/v7x MXU is 2x256^2) but keep 128-alignment for
    # small dims so e.g. Out=16 only pads to 128.  v5e's 128-wide MXU is full
    # width either way.
    align = 256 if n >= 512 else 128
    return _round_up(n, align)


def _vmem_limit_bytes():
    """Generation-dependent VMEM limit with headroom for compiler scratch."""
    cap = 64 << 20  # conservative default (v7x physical VMEM)
    try:
        cap = int(getattr(pltpu.get_tpu_info(), "vmem_capacity_bytes", cap))
    except Exception:
        pass
    # v5e/v6e (128 MiB) -> 100 MiB, v7x (64 MiB) -> 48 MiB.
    return int(min(max(cap - (16 << 20), 32 << 20), 100 << 20))


def _choose_batch_tiling(B, tm_max):
    """Batch tile TM (multiple of 8) and grid length with minimal padding.

    At least 2 tiles whenever B >= 16 so the 'parallel' batch axis actually
    shards across both v7x TensorCores.
    """
    n_tiles = max(_cdiv(B, tm_max), 2 if B >= 16 else 1)
    TM = _round_up(_cdiv(B, n_tiles), 8)
    grid_b = _cdiv(B, TM)  # ragged last tile is masked by Pallas (no padding)
    return TM, grid_b


# ---------------------------------------------------------------------------
# Kernels
# ---------------------------------------------------------------------------

def _mlp_kernel_resident(x_ref, w1_ref, b1_ref, w2_ref, b2_ref, o_ref):
    """Whole hidden dim in one shot; weights VMEM-resident across batch tiles."""
    xb = x_ref[...].astype(w1_ref.dtype)           # f32 -> bf16 in VMEM
    h = jnp.dot(xb, w1_ref[...], preferred_element_type=jnp.float32)
    h = jnp.maximum(h + b1_ref[...], 0.0)          # f32 epilogue (v5e-safe)
    y = jnp.dot(h.astype(w2_ref.dtype), w2_ref[...],
                preferred_element_type=jnp.float32)
    o_ref[...] = (y + b2_ref[...]).astype(o_ref.dtype)


def _mlp_kernel_tiled_h(x_ref, w1_ref, b1_ref, w2_ref, b2_ref, o_ref, acc_ref):
    """Hidden dim tiled as a reduction axis (grid axis 1, 'arbitrary')."""
    hk = pl.program_id(1)

    @pl.when(hk == 0)
    def _init():
        acc_ref[...] = jnp.zeros_like(acc_ref)

    xb = x_ref[...].astype(w1_ref.dtype)
    h = jnp.dot(xb, w1_ref[...], preferred_element_type=jnp.float32)
    h = jnp.maximum(h + b1_ref[...], 0.0)
    acc_ref[...] += jnp.dot(h.astype(w2_ref.dtype), w2_ref[...],
                            preferred_element_type=jnp.float32)

    @pl.when(hk == pl.num_programs(1) - 1)
    def _finalize():
        o_ref[...] = (acc_ref[...] + b2_ref[...]).astype(o_ref.dtype)


# ---------------------------------------------------------------------------
# Wrappers
# ---------------------------------------------------------------------------

def prepare_params(w1, b1, w2, b2):
    """One-time pad + bf16 cast of the parameters (hoisted out of forward).

    w1: [In, H], b1: [H] or [1, H], w2: [H, Out], b2: [Out] or [1, Out]
    (weights are the transpose of PyTorch's nn.Linear storage).
    """
    In, H = w1.shape
    Out = w2.shape[1]
    H_p, Out_p = _pad_dim(H), _pad_dim(Out)

    w1_p = jnp.zeros((In, H_p), jnp.bfloat16).at[:, :H].set(w1.astype(jnp.bfloat16))
    b1_p = jnp.zeros((1, H_p), jnp.float32).at[:, :H].set(
        jnp.asarray(b1, jnp.float32).reshape(1, H))
    w2_p = jnp.zeros((H_p, Out_p), jnp.bfloat16).at[:H, :Out].set(w2.astype(jnp.bfloat16))
    b2_p = jnp.zeros((1, Out_p), jnp.float32).at[:, :Out].set(
        jnp.asarray(b2, jnp.float32).reshape(1, Out))
    # Zero padding is exact: ReLU(0)=0 and zero rows/cols contribute nothing.
    return dict(w1=w1_p, b1=b1_p, w2=w2_p, b2=b2_p, out_features=Out)


def _forward_resident(x, w1_p, b1_p, w2_p, b2_p, *, TM, grid_b, vmem_limit):
    B, In = x.shape
    H_p, Out_p = w1_p.shape[1], w2_p.shape[1]

    def build(weight_mode):
        def wspec(shape):
            # Constant index map -> stays VMEM-resident across batch tiles.
            return pl.BlockSpec(shape, lambda i: (0, 0), pipeline_mode=weight_mode)

        cost = pl.CostEstimate(
            flops=2 * B * In * H_p + 2 * B * H_p * Out_p,
            transcendentals=0,
            bytes_accessed=(x.size * 4 + (w1_p.size + w2_p.size) * 2
                            + (b1_p.size + b2_p.size) * 4 + B * Out_p * 4),
        )
        return pl.pallas_call(
            _mlp_kernel_resident,
            out_shape=jax.ShapeDtypeStruct((B, Out_p), jnp.float32),
            grid_spec=pltpu.PrefetchScalarGridSpec(
                num_scalar_prefetch=0,
                grid=(grid_b,),
                in_specs=[
                    # x: tiled along batch, double-buffered by the pipeline.
                    pl.BlockSpec((TM, In), lambda i: (i, 0)),
                    wspec((In, H_p)),
                    wspec((1, H_p)),
                    wspec((H_p, Out_p)),
                    wspec((1, Out_p)),
                ],
                out_specs=pl.BlockSpec((TM, Out_p), lambda i: (i, 0)),
            ),
            compiler_params=pltpu.CompilerParams(
                dimension_semantics=("parallel",),
                vmem_limit_bytes=vmem_limit,
            ),
            cost_estimate=cost,
        )

    try:
        # Single-buffer the constant-index weights/biases (halves their VMEM
        # footprint -- matters on v7x's 64 MiB VMEM).
        return build(pl.Buffered(1))(x, w1_p, b1_p, w2_p, b2_p)
    except Exception:
        # Fallback: default double buffering (still correct).
        return build(None)(x, w1_p, b1_p, w2_p, b2_p)


def _forward_tiled_h(x, w1_p, b1_p, w2_p, b2_p, *, TM, grid_b, vmem_limit):
    B, In = x.shape
    H_p, Out_p = w1_p.shape[1], w2_p.shape[1]
    TH = 512 if H_p % 512 == 0 else (256 if H_p % 256 == 0 else 128)
    grid_h = H_p // TH

    cost = pl.CostEstimate(
        flops=2 * B * In * H_p + 2 * B * H_p * Out_p,
        transcendentals=0,
        bytes_accessed=(x.size * 4 + grid_b * (w1_p.size + w2_p.size) * 2
                        + (b1_p.size + b2_p.size) * 4 + B * Out_p * 4),
    )
    # TODO(synk): for extremely large In, also tile the fc1 contraction dim.
    return pl.pallas_call(
        _mlp_kernel_tiled_h,
        out_shape=jax.ShapeDtypeStruct((B, Out_p), jnp.float32),
        grid_spec=pltpu.PrefetchScalarGridSpec(
            num_scalar_prefetch=0,
            grid=(grid_b, grid_h),
            in_specs=[
                pl.BlockSpec((TM, In), lambda i, k: (i, 0)),
                pl.BlockSpec((In, TH), lambda i, k: (0, k)),
                pl.BlockSpec((1, TH), lambda i, k: (0, k)),
                pl.BlockSpec((TH, Out_p), lambda i, k: (k, 0)),
                pl.BlockSpec((1, Out_p), lambda i, k: (0, 0)),
            ],
            out_specs=pl.BlockSpec((TM, Out_p), lambda i, k: (i, 0)),
            scratch_shapes=[pltpu.VMEM((TM, Out_p), jnp.float32)],
        ),
        compiler_params=pltpu.CompilerParams(
            dimension_semantics=("parallel", "arbitrary"),
            vmem_limit_bytes=vmem_limit,
        ),
        cost_estimate=cost,
    )(x, w1_p, b1_p, w2_p, b2_p)


def simple_nn_forward(x, params, *, tm_max=1024, force_tiled_h=False):
    """Fused SimpleNN forward: relu(x @ W1 + b1) @ W2 + b2.

    x      : [B, In] float32
    params : dict from prepare_params() (padded/bf16-cast once, reused)
    returns: [B, Out] float32
    """
    B, In = x.shape
    w1_p, b1_p, w2_p, b2_p = params["w1"], params["b1"], params["w2"], params["b2"]
    Out = params["out_features"]
    H_p, Out_p = w1_p.shape[1], w2_p.shape[1]
    assert w1_p.shape[0] == In, "input feature dim mismatch with prepared params"

    vmem_limit = _vmem_limit_bytes()
    TM, grid_b = _choose_batch_tiling(B, tm_max)

    # Resident-weight footprint estimate (single-buffered weights, double-
    # buffered x/out tiles, f32 activations + slack).
    resident_bytes = ((w1_p.size + w2_p.size) * 2 + (b1_p.size + b2_p.size) * 4
                      + 2 * TM * In * 4 + 2 * TM * Out_p * 4 + 2 * TM * H_p * 4)
    use_resident = (not force_tiled_h) and resident_bytes <= int(0.75 * vmem_limit)

    if use_resident:
        out_p = _forward_resident(x, w1_p, b1_p, w2_p, b2_p,
                                  TM=TM, grid_b=grid_b, vmem_limit=vmem_limit)
    else:
        out_p = _forward_tiled_h(x, w1_p, b1_p, w2_p, b2_p,
                                 TM=TM, grid_b=grid_b, vmem_limit=vmem_limit)

    # Strip lane padding only (no batch padding was added).
    return out_p[:, :Out]


def init_params(key, input_size, hidden_size, output_size):
    """PyTorch nn.Linear-style U(-1/sqrt(fan_in), +) init, stored as [in, out]."""
    k1, k2, k3, k4 = jax.random.split(key, 4)
    bound1 = 1.0 / jnp.sqrt(input_size)
    bound2 = 1.0 / jnp.sqrt(hidden_size)
    w1 = jax.random.uniform(k1, (input_size, hidden_size), jnp.float32,
                            minval=-bound1, maxval=bound1)
    b1 = jax.random.uniform(k2, (1, hidden_size), jnp.float32,
                            minval=-bound1, maxval=bound1)
    w2 = jax.random.uniform(k3, (hidden_size, output_size), jnp.float32,
                            minval=-bound2, maxval=bound2)
    b2 = jax.random.uniform(k4, (1, output_size), jnp.float32,
                            minval=-bound2, maxval=bound2)
    return w1, b1, w2, b2


if __name__ == "__main__":
    key = jax.random.PRNGKey(0)
    kx, kp = jax.random.split(key)

    # ---- Test 1: small SimpleNN shapes, resident-weight path ---------------
    batch, input_size, hidden_size, output_size = 8, 32, 64, 16
    x = jax.random.normal(kx, (batch, input_size), jnp.float32)
    w1, b1, w2, b2 = init_params(kp, input_size, hidden_size, output_size)
    params = prepare_params(w1, b1, w2, b2)      # one-time pad/cast (hoisted)

    out = jax.block_until_ready(simple_nn_forward(x, params))
    assert out.shape == (batch, output_size)

    # Matched-precision reference (bf16 operands, f32 math).
    xb = x.astype(jnp.bfloat16).astype(jnp.float32)
    w1b = w1.astype(jnp.bfloat16).astype(jnp.float32)
    w2b = w2.astype(jnp.bfloat16).astype(jnp.float32)
    h_ref = jnp.maximum(xb @ w1b + b1, 0.0)
    ref_matched = h_ref.astype(jnp.bfloat16).astype(jnp.float32) @ w2b + b2
    assert jnp.allclose(out, ref_matched, atol=1e-2, rtol=1e-2)

    # Pure-f32 PyTorch-equivalent reference (loose tolerance for bf16 operands).
    ref_f32 = jnp.maximum(x @ w1 + b1, 0.0) @ w2 + b2
    assert jnp.allclose(out, ref_f32, atol=5e-2, rtol=5e-2)

    # ---- Test 2: larger shapes -> multi-tile batch grid (>=2 tiles, ragged
    # last tile) and the tiled-H reduction kernel (forced) -------------------
    batch2, in2, hid2, out2 = 50, 96, 1024, 24
    k1, k2 = jax.random.split(kp)
    x2 = jax.random.normal(k1, (batch2, in2), jnp.float32)
    p2_raw = init_params(k2, in2, hid2, out2)
    params2 = prepare_params(*p2_raw)

    y_resident = jax.block_until_ready(simple_nn_forward(x2, params2))
    y_tiled = jax.block_until_ready(
        simple_nn_forward(x2, params2, force_tiled_h=True))
    ref2 = jnp.maximum(x2 @ p2_raw[0] + p2_raw[1], 0.0) @ p2_raw[2] + p2_raw[3]
    assert y_resident.shape == (batch2, out2)
    assert jnp.allclose(y_resident, ref2, atol=5e-2, rtol=5e-2)
    assert jnp.allclose(y_tiled, ref2, atol=5e-2, rtol=5e-2)

    print("KERNEL_OK")
</pallas_src>

<mosaic_0001>
module attributes {stable_mosaic.version = 11 : i64} {
  func.func @_mlp_kernel_resident(%arg0: i32, %arg1: memref<8x32xf32, #tpu.memory_space<vmem>>, %arg2: memref<32x128xbf16, #tpu.memory_space<vmem>>, %arg3: memref<1x128xf32, #tpu.memory_space<vmem>>, %arg4: memref<128x128xbf16, #tpu.memory_space<vmem>>, %arg5: memref<1x128xf32, #tpu.memory_space<vmem>>, %arg6: memref<8x128xf32, #tpu.memory_space<vmem>>) attributes {dimension_semantics = [#tpu.dimension_semantics<parallel>], iteration_bounds = array<i64: 1>, scalar_prefetch = 0 : i64, scratch_operands = 0 : i64, tpu.core_type = #tpu.core_type<tc>, window_params = [{transform_indices = @transform_0, window_bounds = array<i64: 8, 32>}, {pipeline_mode = #tpu.pipeline_mode<synchronous>, transform_indices = @transform_1, window_bounds = array<i64: 32, 128>}, {pipeline_mode = #tpu.pipeline_mode<synchronous>, transform_indices = @transform_2, window_bounds = array<i64: 1, 128>}, {pipeline_mode = #tpu.pipeline_mode<synchronous>, transform_indices = @transform_3, window_bounds = array<i64: 128, 128>}, {pipeline_mode = #tpu.pipeline_mode<synchronous>, transform_indices = @transform_4, window_bounds = array<i64: 1, 128>}, {transform_indices = @transform_5, window_bounds = array<i64: 8, 128>}]} {
    %c0 = arith.constant 0 : index
    %c0_0 = arith.constant 0 : index
    %0 = vector.load %arg1[%c0, %c0_0] : memref<8x32xf32, #tpu.memory_space<vmem>>, vector<8x32xf32>
    %1 = arith.truncf %0 : vector<8x32xf32> to vector<8x32xbf16>
    %c0_1 = arith.constant 0 : index
    %c0_2 = arith.constant 0 : index
    %2 = vector.load %arg2[%c0_1, %c0_2] : memref<32x128xbf16, #tpu.memory_space<vmem>>, vector<32x128xbf16>
    %cst = arith.constant dense<0.000000e+00> : vector<8x128xf32>
    %3 = tpu.matmul %1, %2, %cst {dimension_numbers = #tpu.dot_dimension_numbers<[1], [0], [0], [1], [0, 0, 1, 1], [], []>} : vector<8x32xbf16>, vector<32x128xbf16>, vector<8x128xf32> -> vector<8x128xf32>
    %c0_3 = arith.constant 0 : index
    %c0_4 = arith.constant 0 : index
    %4 = vector.load %arg3[%c0_3, %c0_4] : memref<1x128xf32, #tpu.memory_space<vmem>>, vector<1x128xf32>
    %5 = vector.broadcast %4 : vector<1x128xf32> to vector<8x128xf32>
    %6 = arith.addf %3, %5 : vector<8x128xf32>
    %cst_5 = arith.constant 0.000000e+00 : f32
    %7 = vector.broadcast %cst_5 : f32 to vector<8x128xf32>
    %8 = arith.maximumf %6, %7 : vector<8x128xf32>
    %9 = arith.truncf %8 : vector<8x128xf32> to vector<8x128xbf16>
    %c0_6 = arith.constant 0 : index
    %c0_7 = arith.constant 0 : index
    %10 = vector.load %arg4[%c0_6, %c0_7] : memref<128x128xbf16, #tpu.memory_space<vmem>>, vector<128x128xbf16>
    %cst_8 = arith.constant dense<0.000000e+00> : vector<8x128xf32>
    %11 = tpu.matmul %9, %10, %cst_8 {dimension_numbers = #tpu.dot_dimension_numbers<[1], [0], [0], [1], [0, 0, 1, 1], [], []>} : vector<8x128xbf16>, vector<128x128xbf16>, vector<8x128xf32> -> vector<8x128xf32>
    %c0_9 = arith.constant 0 : index
    %c0_10 = arith.constant 0 : index
    %12 = vector.load %arg5[%c0_9, %c0_10] : memref<1x128xf32, #tpu.memory_space<vmem>>, vector<1x128xf32>
    %13 = vector.broadcast %12 : vector<1x128xf32> to vector<8x128xf32>
    %14 = arith.addf %11, %13 : vector<8x128xf32>
    %c0_11 = arith.constant 0 : index
    %c0_12 = arith.constant 0 : index
    %15 = vector.load %arg6[%c0_11, %c0_12] : memref<8x128xf32, #tpu.memory_space<vmem>>, vector<8x128xf32>
    tpu.vector_store %arg6[%c0_11, %c0_12], %14 {strides = array<i32>} : memref<8x128xf32, #tpu.memory_space<vmem>>, vector<8x128xf32>,
    return
  }
  func.func @transform_0(%arg0: i32) -> (i32, i32) {
    %c0_i32 = arith.constant 0 : i32
    %c0_i32_0 = arith.constant 0 : i32
    return %arg0, %c0_i32 : i32, i32
  }
  func.func @transform_1(%arg0: i32) -> (i32, i32) {
    %c0_i32 = arith.constant 0 : i32
    %c0_i32_0 = arith.constant 0 : i32
    %c0_i32_1 = arith.constant 0 : i32
    return %c0_i32, %c0_i32_0 : i32, i32
  }
  func.func @transform_2(%arg0: i32) -> (i32, i32) {
    %c0_i32 = arith.constant 0 : i32
    %c0_i32_0 = arith.constant 0 : i32
    %c0_i32_1 = arith.constant 0 : i32
    return %c0_i32, %c0_i32_0 : i32, i32
  }
  func.func @transform_3(%arg0: i32) -> (i32, i32) {
    %c0_i32 = arith.constant 0 : i32
    %c0_i32_0 = arith.constant 0 : i32
    %c0_i32_1 = arith.constant 0 : i32
    return %c0_i32, %c0_i32_0 : i32, i32
  }
  func.func @transform_4(%arg0: i32) -> (i32, i32) {
    %c0_i32 = arith.constant 0 : i32
    %c0_i32_0 = arith.constant 0 : i32
    %c0_i32_1 = arith.constant 0 : i32
    return %c0_i32, %c0_i32_0 : i32, i32
  }
  func.func @transform_5(%arg0: i32) -> (i32, i32) {
    %c0_i32 = arith.constant 0 : i32
    %c0_i32_0 = arith.constant 0 : i32
    return %arg0, %c0_i32 : i32, i32
  }
}

module attributes {stable_mosaic.version = 11 : i64} {
  func.func @_mlp_kernel_resident(%arg0: i32, %arg1: memref<8x32xf32, #tpu.memory_space<vmem>>, %arg2: memref<32x128xbf16, #tpu.memory_space<vmem>>, %arg3: memref<1x128xf32, #tpu.memory_space<vmem>>, %arg4: memref<128x128xbf16, #tpu.memory_space<vmem>>, %arg5: memref<1x128xf32, #tpu.memory_space<vmem>>, %arg6: memref<8x128xf32, #tpu.memory_space<vmem>>) attributes {dimension_semantics = [#tpu.dimension_semantics<parallel>], iteration_bounds = array<i64: 1>, scalar_prefetch = 0 : i64, scratch_operands = 0 : i64, tpu.core_type = #tpu.core_type<tc>, window_params = [{transform_indices = @transform_0, window_bounds = array<i64: 8, 32>}, {pipeline_mode = #tpu.pipeline_mode<synchronous>, transform_indices = @transform_1, window_bounds = array<i64: 32, 128>}, {pipeline_mode = #tpu.pipeline_mode<synchronous>, transform_indices = @transform_2, window_bounds = array<i64: 1, 128>}, {pipeline_mode = #tpu.pipeline_mode<synchronous>, transform_indices = @transform_3, window_bounds = array<i64: 128, 128>}, {pipeline_mode = #tpu.pipeline_mode<synchronous>, transform_indices = @transform_4, window_bounds = array<i64: 1, 128>}, {transform_indices = @transform_5, window_bounds = array<i64: 8, 128>}]} {
    %c0 = arith.constant 0 : index
    %c0_0 = arith.constant 0 : index
    %0 = vector.load %arg1[%c0, %c0_0] : memref<8x32xf32, #tpu.memory_space<vmem>>, vector<8x32xf32>
    %1 = arith.truncf %0 : vector<8x32xf32> to vector<8x32xbf16>
    %c0_1 = arith.constant 0 : index
    %c0_2 = arith.constant 0 : index
    %2 = vector.load %arg2[%c0_1, %c0_2] : memref<32x128xbf16, #tpu.memory_space<vmem>>, vector<32x128xbf16>
    %cst = arith.constant dense<0.000000e+00> : vector<8x128xf32>
    %3 = tpu.matmul %1, %2, %cst {dimension_numbers = #tpu.dot_dimension_numbers<[1], [0], [0], [1], [0, 0, 1, 1], [], []>} : vector<8x32xbf16>, vector<32x128xbf16>, vector<8x128xf32> -> vector<8x128xf32>
    %c0_3 = arith.constant 0 : index
    %c0_4 = arith.constant 0 : index
    %4 = vector.load %arg3[%c0_3, %c0_4] : memref<1x128xf32, #tpu.memory_space<vmem>>, vector<1x128xf32>
    %5 = vector.broadcast %4 : vector<1x128xf32> to vector<8x128xf32>
    %6 = arith.addf %3, %5 : vector<8x128xf32>
    %cst_5 = arith.constant 0.000000e+00 : f32
    %7 = vector.broadcast %cst_5 : f32 to vector<8x128xf32>
    %8 = arith.maximumf %6, %7 : vector<8x128xf32>
    %9 = arith.truncf %8 : vector<8x128xf32> to vector<8x128xbf16>
    %c0_6 = arith.constant 0 : index
    %c0_7 = arith.constant 0 : index
    %10 = vector.load %arg4[%c0_6, %c0_7] : memref<128x128xbf16, #tpu.memory_space<vmem>>, vector<128x128xbf16>
    %cst_8 = arith.constant dense<0.000000e+00> : vector<8x128xf32>
    %11 = tpu.matmul %9, %10, %cst_8 {dimension_numbers = #tpu.dot_dimension_numbers<[1], [0], [0], [1], [0, 0, 1, 1], [], []>} : vector<8x128xbf16>, vector<128x128xbf16>, vector<8x128xf32> -> vector<8x128xf32>
    %c0_9 = arith.constant 0 : index
    %c0_10 = arith.constant 0 : index
    %12 = vector.load %arg5[%c0_9, %c0_10] : memref<1x128xf32, #tpu.memory_space<vmem>>, vector<1x128xf32>
    %13 = vector.broadcast %12 : vector<1x128xf32> to vector<8x128xf32>
    %14 = arith.addf %11, %13 : vector<8x128xf32>
    %c0_11 = arith.constant 0 : index
    %c0_12 = arith.constant 0 : index
    %15 = vector.load %arg6[%c0_11, %c0_12] : memref<8x128xf32, #tpu.memory_space<vmem>>, vector<8x128xf32>
    tpu.vector_store %arg6[%c0_11, %c0_12], %14 {strides = array<i32>} : memref<8x128xf32, #tpu.memory_space<vmem>>, vector<8x128xf32>,
    return
  }
  func.func @transform_0(%arg0: i32) -> (i32, i32) {
    %c0_i32 = arith.constant 0 : i32
    %c0_i32_0 = arith.constant 0 : i32
    return %arg0, %c0_i32 : i32, i32
  }
  func.func @transform_1(%arg0: i32) -> (i32, i32) {
    %c0_i32 = arith.constant 0 : i32
    %c0_i32_0 = arith.constant 0 : i32
    %c0_i32_1 = arith.constant 0 : i32
    return %c0_i32, %c0_i32_0 : i32, i32
  }
  func.func @transform_2(%arg0: i32) -> (i32, i32) {
    %c0_i32 = arith.constant 0 : i32
    %c0_i32_0 = arith.constant 0 : i32
    %c0_i32_1 = arith.constant 0 : i32
    return %c0_i32, %c0_i32_0 : i32, i32
  }
  func.func @transform_3(%arg0: i32) -> (i32, i32) {
    %c0_i32 = arith.constant 0 : i32
    %c0_i32_0 = arith.constant 0 : i32
    %c0_i32_1 = arith.constant 0 : i32
    return %c0_i32, %c0_i32_0 : i32, i32
  }
  func.func @transform_4(%arg0: i32) -> (i32, i32) {
    %c0_i32 = arith.constant 0 : i32
    %c0_i32_0 = arith.constant 0 : i32
    %c0_i32_1 = arith.constant 0 : i32
    return %c0_i32, %c0_i32_0 : i32, i32
  }
  func.func @transform_5(%arg0: i32) -> (i32, i32) {
    %c0_i32 = arith.constant 0 : i32
    %c0_i32_0 = arith.constant 0 : i32
    return %arg0, %c0_i32 : i32, i32
  }
}

</mosaic_0001>

<bundles_post_ra>
// kernel: tpu_custom_call.1
= control target key start
LH: loop header
LB: loop body
LE: loop exit
PB: predicated region body
PF: predicated region fallthrough
CT: control target
= control target key end

     0   :  { %10 = vsyncpa [#allocation3], 0  ;;  %s423_s0 = inlined_call_operand.hbm [shape: f32[8,32], index: 0, kind: input, shape index: {}]   ;;  %s424_s1 = inlined_call_operand.hbm [shape: bf16[32,128], index: 1, kind: input, shape index: {}]   ;;  %s425_s2 = inlined_call_operand.vmem [shape: f32[1,128], index: 2, kind: input, shape index: {}]   ;;  %s426_s3 = inlined_call_operand.hbm [shape: bf16[128,128], index: 3, kind: input, shape index: {}]   ;;  %s427_s4 = inlined_call_operand.vmem [shape: f32[1,128], index: 4, kind: input, shape index: {}]   ;;  %s428_s5 = inlined_call_operand.hbm [shape: f32[8,128], index: 5, kind: output, shape index: {}]  }
   0x1   :  { %11 = vsyncpa [#allocation6], 0  ;;  %s28_s20 = sshll.u32 %s424_s1, 4  ;;  %s29_s20 = int_to_ptr.hbm [resolvable:$true] %s28_s20 }
   0x2   :  { %12 = vsyncpa [#allocation4], 0  ;;  %s369_s21 = smov [#allocation5]   ;;  %s18_s25 = sshll.u32 %s423_s0, 4  ;;  %s19_s25 = int_to_ptr.hbm [resolvable:$true] %s18_s25 }
   0x3   :  { %s30_s22 = sshll.u32 %s369_s21, 4  ;;  %s370_s26 = smov 64   ;;  %s31_s22 = int_to_ptr.vmem [resolvable:$true] %s30_s22 }
   0x4   :  { %s371_s27 = smov 4   ;;  %s372_s28 = smov [#allocation2]  }
   0x5   :  { %36 = dma.hbm_to_vmem [thread:$0]  %s29_s20, 256, %s31_s22, [#allocation6], %s370_s26, %s370_s26, %s371_s27  }
   0x6   :  { %s20_s29 = sshll.u32 %s372_s28, 4  ;;  %s43_s7 = sshll.u32 %s426_s3, 4  ;;  %s21_s29 = int_to_ptr.vmem [resolvable:$true] %s20_s29  ;;  %s44_s7 = int_to_ptr.hbm [resolvable:$true] %s43_s7 }
   0x7   :  { %23 = dma.hbm_to_vmem [thread:$0]  %s19_s25, 128, %s21_s29, [#allocation3]  }
   0x8   :  { %s373_s1 = smov [#allocation7]  }
   0x9   :  { %s45_s8 = sshll.u32 %s373_s1, 4  ;;  %s46_s8 = int_to_ptr.vmem [resolvable:$true] %s45_s8 }
   0xa   :  { %51 = dma.hbm_to_vmem [thread:$0]  %s44_s7, 1024, %s46_s8, [#allocation6], %s370_s26, %s370_s26, %s371_s27  }
   0xb   :  { %363 = dma.done.wait [#allocation3], 128  }
   0xc   :  { %364 = vsyncadd [#allocation3], 4294967168 }
   0xd   :  { %365 = dma.done.wait [#allocation6], 1280  }
   0xe   :  { %366 = vsyncadd [#allocation6], 4294966016  ;;  %v250_v0 = vld [vmem:[#allocation5 + $0x8] sm:$0xff]  ;;  %v249_v2 = vld [vmem:[#allocation5] sm:$0xff]  ;;  %vm89_vm0 = vcmask 261120   ;;  %s374_s11 = smov [#allocation8]  }
   0xf   :  { %v258_v1 = vld [vmem:[#allocation7 + $0x38] sm:$0xff]  ;;  %99 = vmatpush.bf16.msra.mxu0 %v250_v0  ;;  %v67_v3 = vld [vmem:[#allocation2] sm:$0xff]  ;;  %v257_v4 = vld [vmem:[#allocation7 + $0x30] sm:$0xff]  ;;  %s195_s12 = sshll.u32 %s374_s11, 4  ;;  %s197_s15 = sshll.u32 %s428_s5, 4  ;;  %s196_s12 = int_to_ptr.vmem [resolvable:$true] %s195_s12  ;;  %s198_s15 = int_to_ptr.hbm [resolvable:$true] %s197_s15 }
  0x10   :  { %176 = vmatpush.bf16.msra.mxu1 %v258_v1  ;;  %v68_v5 = vpack.c.bf16 %v67_v3, %v67_v3  ;;  %v256_v6 = vld [vmem:[#allocation7 + $0x28] sm:$0xff]  ;;  %v255_v7 = vld [vmem:[#allocation7 + $0x20] sm:$0xff]  ;;  %v254_v8 = vld [vmem:[#allocation7 + $0x18] sm:$0xff] }
  0x11   :  { %v253_v9 = vld [vmem:[#allocation7 + $0x10] sm:$0xff]  ;;  %v252_v10 = vld [vmem:[#allocation7 + $0x8] sm:$0xff]  ;;  %v251_v11 = vld [vmem:[#allocation7] sm:$0xff] }
  0x12   :  { %v265_v12 = vld [vmem:[%s425_s2] ss:$0 sm:$0xff] }
  0x13   :  { %100 = vmatpush.bf16.msra.mxu0 %v249_v2  ;;  %v266_v18 = vld [vmem:[%s427_s4] ss:$0 sm:$0xff] }
  0x14   :  { %177 = vmatpush.bf16.msra.mxu1 %v257_v4 }
  0x16   :  { %216 = vmatmul.msk.bf16.vlgmr.msra.gmra.mxu0 %vm89_vm0, %v68_v5 }
  0x18   :  { %178 = vmatpush.bf16.msra.mxu1 %v256_v6 }
  0x1c   :  { %179 = vmatpush.bf16.msra.mxu1 %v255_v7 }
  0x20   :  { %180 = vmatpush.bf16.msra.mxu1 %v254_v8 }
  0x24   :  { %181 = vmatpush.bf16.msra.mxu1 %v253_v9 }
  0x28   :  { %182 = vmatpush.bf16.msra.mxu1 %v252_v10 }
  0x2c   :  { %183 = vmatpush.bf16.msra.mxu1 %v251_v11 }
  0x93   :  { %v102_v13 = vpop.f32.mrf.mxu0 }
  0x94   :  { %v103_v14 = vadd.f32 %v265_v12, %v102_v13 }
  0x96   :  { %v106_v15 = vmax.f32 %v103_v14, 0.0 }
  0x98   :  { %v107_v16 = vpack.c.bf16 %v106_v15, %v106_v15 }
  0x9a   :  { %184 = vmatmul.bf16.vlgmr.msra.gmra.mxu1 %v107_v16 }
  0x9b   :  { %v104_v17 = vpop.f32.mrf.mxu0 }
 0x117   :  { %v185_v19 = vpop.f32.mrf.mxu1 }
 0x118   :  { %v186_v20 = vadd.f32 %v266_v18, %v185_v19 }
 0x11a   :  { %189 = vst [vmem:[#allocation8] sm:$0xff] %v186_v20 }
 0x11b   :  { %200 = dma.vmem_to_hbm [thread:$0]  %s196_s12, 128, %s198_s15, [#allocation4]  }
 0x11f   :  { %v187_v21 = vpop.f32.mrf.mxu1 }
 0x120   :  { %367 = dma.done.wait [#allocation4], 128  }
 0x121   :  { %368 = vsyncadd [#allocation4], 4294967168 }
 0x122   :  { %205 = vsyncpa [#allocation3], 1 }
 0x123   :  { %206 = vsyncpa [#allocation6], 1 }
 0x124   :  { %207 = vsyncpa [#allocation4], 1 }

// kernel: tpu_custom_call.1
= control target key start
LH: loop header
LB: loop body
LE: loop exit
PB: predicated region body
PF: predicated region fallthrough
CT: control target
= control target key end

     0   :  { %10 = vsyncpa [#allocation3], 0  ;;  %s423_s0 = inlined_call_operand.hbm [shape: f32[8,32], index: 0, kind: input, shape index: {}]   ;;  %s424_s1 = inlined_call_operand.hbm [shape: bf16[32,128], index: 1, kind: input, shape index: {}]   ;;  %s425_s2 = inlined_call_operand.vmem [shape: f32[1,128], index: 2, kind: input, shape index: {}]   ;;  %s426_s3 = inlined_call_operand.hbm [shape: bf16[128,128], index: 3, kind: input, shape index: {}]   ;;  %s427_s4 = inlined_call_operand.vmem [shape: f32[1,128], index: 4, kind: input, shape index: {}]   ;;  %s428_s5 = inlined_call_operand.hbm [shape: f32[8,128], index: 5, kind: output, shape index: {}]  }
   0x1   :  { %11 = vsyncpa [#allocation6], 0  ;;  %s28_s20 = sshll.u32 %s424_s1, 4  ;;  %s29_s20 = int_to_ptr.hbm [resolvable:$true] %s28_s20 }
   0x2   :  { %12 = vsyncpa [#allocation4], 0  ;;  %s369_s21 = smov [#allocation5]   ;;  %s18_s25 = sshll.u32 %s423_s0, 4  ;;  %s19_s25 = int_to_ptr.hbm [resolvable:$true] %s18_s25 }
   0x3   :  { %s30_s22 = sshll.u32 %s369_s21, 4  ;;  %s370_s26 = smov 64   ;;  %s31_s22 = int_to_ptr.vmem [resolvable:$true] %s30_s22 }
   0x4   :  { %s371_s27 = smov 4   ;;  %s372_s28 = smov [#allocation2]  }
   0x5   :  { %36 = dma.hbm_to_vmem [thread:$0]  %s29_s20, 256, %s31_s22, [#allocation6], %s370_s26, %s370_s26, %s371_s27  }
   0x6   :  { %s20_s29 = sshll.u32 %s372_s28, 4  ;;  %s43_s7 = sshll.u32 %s426_s3, 4  ;;  %s21_s29 = int_to_ptr.vmem [resolvable:$true] %s20_s29  ;;  %s44_s7 = int_to_ptr.hbm [resolvable:$true] %s43_s7 }
   0x7   :  { %23 = dma.hbm_to_vmem [thread:$0]  %s19_s25, 128, %s21_s29, [#allocation3]  }
   0x8   :  { %s373_s1 = smov [#allocation7]  }
   0x9   :  { %s45_s8 = sshll.u32 %s373_s1, 4  ;;  %s46_s8 = int_to_ptr.vmem [resolvable:$true] %s45_s8 }
   0xa   :  { %51 = dma.hbm_to_vmem [thread:$0]  %s44_s7, 1024, %s46_s8, [#allocation6], %s370_s26, %s370_s26, %s371_s27  }
   0xb   :  { %363 = dma.done.wait [#allocation3], 128  }
   0xc   :  { %364 = vsyncadd [#allocation3], 4294967168 }
   0xd   :  { %365 = dma.done.wait [#allocation6], 1280  }
   0xe   :  { %366 = vsyncadd [#allocation6], 4294966016  ;;  %v250_v0 = vld [vmem:[#allocation5 + $0x8] sm:$0xff]  ;;  %v249_v2 = vld [vmem:[#allocation5] sm:$0xff]  ;;  %vm89_vm0 = vcmask 261120   ;;  %s374_s11 = smov [#allocation8]  }
   0xf   :  { %v258_v1 = vld [vmem:[#allocation7 + $0x38] sm:$0xff]  ;;  %99 = vmatpush.bf16.msra.mxu0 %v250_v0  ;;  %v67_v3 = vld [vmem:[#allocation2] sm:$0xff]  ;;  %v257_v4 = vld [vmem:[#allocation7 + $0x30] sm:$0xff]  ;;  %s195_s12 = sshll.u32 %s374_s11, 4  ;;  %s197_s15 = sshll.u32 %s428_s5, 4  ;;  %s196_s12 = int_to_ptr.vmem [resolvable:$true] %s195_s12  ;;  %s198_s15 = int_to_ptr.hbm [resolvable:$true] %s197_s15 }
  0x10   :  { %176 = vmatpush.bf16.msra.mxu1 %v258_v1  ;;  %v68_v5 = vpack.c.bf16 %v67_v3, %v67_v3  ;;  %v256_v6 = vld [vmem:[#allocation7 + $0x28] sm:$0xff]  ;;  %v255_v7 = vld [vmem:[#allocation7 + $0x20] sm:$0xff]  ;;  %v254_v8 = vld [vmem:[#allocation7 + $0x18] sm:$0xff] }
  0x11   :  { %v253_v9 = vld [vmem:[#allocation7 + $0x10] sm:$0xff]  ;;  %v252_v10 = vld [vmem:[#allocation7 + $0x8] sm:$0xff]  ;;  %v251_v11 = vld [vmem:[#allocation7] sm:$0xff] }
  0x12   :  { %v265_v12 = vld [vmem:[%s425_s2] ss:$0 sm:$0xff] }
  0x13   :  { %100 = vmatpush.bf16.msra.mxu0 %v249_v2  ;;  %v266_v18 = vld [vmem:[%s427_s4] ss:$0 sm:$0xff] }
  0x14   :  { %177 = vmatpush.bf16.msra.mxu1 %v257_v4 }
  0x16   :  { %216 = vmatmul.msk.bf16.vlgmr.msra.gmra.mxu0 %vm89_vm0, %v68_v5 }
  0x18   :  { %178 = vmatpush.bf16.msra.mxu1 %v256_v6 }
  0x1c   :  { %179 = vmatpush.bf16.msra.mxu1 %v255_v7 }
  0x20   :  { %180 = vmatpush.bf16.msra.mxu1 %v254_v8 }
  0x24   :  { %181 = vmatpush.bf16.msra.mxu1 %v253_v9 }
  0x28   :  { %182 = vmatpush.bf16.msra.mxu1 %v252_v10 }
  0x2c   :  { %183 = vmatpush.bf16.msra.mxu1 %v251_v11 }
  0x93   :  { %v102_v13 = vpop.f32.mrf.mxu0 }
  0x94   :  { %v103_v14 = vadd.f32 %v265_v12, %v102_v13 }
  0x96   :  { %v106_v15 = vmax.f32 %v103_v14, 0.0 }
  0x98   :  { %v107_v16 = vpack.c.bf16 %v106_v15, %v106_v15 }
  0x9a   :  { %184 = vmatmul.bf16.vlgmr.msra.gmra.mxu1 %v107_v16 }
  0x9b   :  { %v104_v17 = vpop.f32.mrf.mxu0 }
 0x117   :  { %v185_v19 = vpop.f32.mrf.mxu1 }
 0x118   :  { %v186_v20 = vadd.f32 %v266_v18, %v185_v19 }
 0x11a   :  { %189 = vst [vmem:[#allocation8] sm:$0xff] %v186_v20 }
 0x11b   :  { %200 = dma.vmem_to_hbm [thread:$0]  %s196_s12, 128, %s198_s15, [#allocation4]  }
 0x11f   :  { %v187_v21 = vpop.f32.mrf.mxu1 }
 0x120   :  { %367 = dma.done.wait [#allocation4], 128  }
 0x121   :  { %368 = vsyncadd [#allocation4], 4294967168 }
 0x122   :  { %205 = vsyncpa [#allocation3], 1 }
 0x123   :  { %206 = vsyncpa [#allocation6], 1 }
 0x124   :  { %207 = vsyncpa [#allocation4], 1 }

</bundles_post_ra>
